<compile_context>
chip_gen: v7x
topology: tpu7x:2x2x1
jax: 0.10.0
libtpu: 0.0.40
codegen_flags: <defaults>
</compile_context>

<pallas_src>
import math

import jax
import jax.numpy as jnp
from jax.experimental import pallas as pl
from jax.experimental.pallas import tpu as pltpu


_TILE_BYTES = 2 * 1024 * 1024   # ~2 MiB per block; 4x resident (double-buffered
                                # in + out) = 8 MiB, safe under v5e's 16 MiB
                                # default scoped VMEM and near roofline everywhere.
_MAX_LANES = 2048               # widest lane tile we consider (8 KiB f32 rows).
_SUBLANE = {4: 8, 2: 16, 1: 32}  # dtype-aware sublane multiple.


def _scale_kernel(x_ref, s_ref, o_ref):
    # x_ref: (TR, TS) tile in VMEM; s_ref: (1, 1) f32 scalar in SMEM.
    # Cast the scalar (cheap, scalar-unit) so the vector multiply stays in
    # x's native dtype -- no per-vreg promotion/demotion for bf16 inputs.
    s = s_ref[0, 0].astype(o_ref.dtype)
    o_ref[...] = x_ref[...] * s


def _round_up(v, m):
    return ((v + m - 1) // m) * m


def _lane_dense_view(x):
    """2-D lane-dense view of x (metadata-only reshape for contiguous arrays)."""
    n = x.size
    if n % 128 == 0 and n > 0:
        # Flatten the whole buffer: pick the widest lane width <= _MAX_LANES
        # that is a multiple of 128 and divides n (every block fully
        # contiguous, every store full-width).
        for k in range(_MAX_LANES // 128, 0, -1):
            lanes = 128 * k
            if n % lanes == 0:
                return x.reshape(n // lanes, lanes)
    # Fallback (e.g. 7x7 heads): leading dims -> rows, trailing dims -> lanes.
    if x.ndim <= 1:
        return x.reshape(1, -1)
    if x.ndim == 2:
        return x
    lead = math.prod(x.shape[:-2])
    return x.reshape(lead, x.shape[-2] * x.shape[-1])


def _pick_tiles(R, S, itemsize, sub):
    """Choose (tr, ts): lane tile full-width when possible, ~2 MiB blocks."""
    # Lane tile: full extent when it fits (always legal); otherwise a wide
    # multiple of 128 with a ragged edge block.
    ts = S if S <= _MAX_LANES else _MAX_LANES

    row_bytes = max(1, ts * itemsize)
    target_rows = max(sub, (_TILE_BYTES // row_bytes) // sub * sub)

    if R <= target_rows:
        tr = R  # full extent along rows -> single row block
        # v7x: if the single block is big enough to matter, split into two
        # row blocks so both TensorCores stream part of it.
        if R >= 2 * sub and R * ts * itemsize >= (1 << 20):
            tr = _round_up(-(-R // 2), sub)
    else:
        tr = target_rows
    return tr, ts


def scale_forward(x, scale):
    """out = x * scale, where `scale` is a 1-element array (nn.Parameter([v]))."""
    orig_shape = x.shape

    x2 = _lane_dense_view(x)
    R, S = x2.shape
    itemsize = jnp.dtype(x2.dtype).itemsize
    sub = _SUBLANE.get(itemsize, 8)

    tr, ts = _pick_tiles(R, S, itemsize, sub)
    grid = (pl.cdiv(R, tr), pl.cdiv(S, ts))

    s2 = jnp.asarray(scale, dtype=jnp.float32).reshape(1, 1)

    out2 = pl.pallas_call(
        _scale_kernel,
        out_shape=jax.ShapeDtypeStruct((R, S), x.dtype),
        grid=grid,
        in_specs=[
            pl.BlockSpec((tr, ts), lambda i, j: (i, j)),
            pl.BlockSpec(memory_space=pltpu.MemorySpace.SMEM),
        ],
        out_specs=pl.BlockSpec((tr, ts), lambda i, j: (i, j)),
        compiler_params=pltpu.CompilerParams(
            dimension_semantics=("parallel", "parallel"),
        ),
        cost_estimate=pl.CostEstimate(
            flops=int(x.size),
            transcendentals=0,
            bytes_accessed=int(2 * x.size * itemsize + 4),
        ),
    )(x2, s2)
    return out2.reshape(orig_shape)


def _reference(x, scale):
    # Pure-JAX reference mirroring the PyTorch forward (broadcast multiply).
    return x * jnp.asarray(scale, dtype=jnp.float32).reshape(())


if __name__ == "__main__":
    key = jax.random.PRNGKey(0)
    kx1, kx2, ks = jax.random.split(key, 3)

    # Learnable scalar, shaped like nn.Parameter(torch.FloatTensor([init_value])),
    # perturbed from 1.0 so the multiply is non-trivial.
    scale = jnp.ones((1,), dtype=jnp.float32) + 0.5 * jax.random.normal(
        ks, (1,), dtype=jnp.float32
    )

    # Case 1: element count divisible by 128 -> flattened lane-dense fast path.
    x1 = jax.random.normal(kx1, (2, 4, 16, 16), dtype=jnp.float32)
    out1 = jax.block_until_ready(scale_forward(x1, scale))
    ref1 = jax.block_until_ready(_reference(x1, scale))
    assert out1.shape == x1.shape, out1.shape
    assert jnp.allclose(out1, ref1, atol=1e-6, rtol=1e-6), "mismatch (fast path)"

    # Case 2: odd spatial size (7x7 detection head) -> fallback 2-D view path.
    x2 = jax.random.normal(kx2, (2, 4, 7, 7), dtype=jnp.float32)
    out2 = jax.block_until_ready(scale_forward(x2, scale))
    ref2 = jax.block_until_ready(_reference(x2, scale))
    assert out2.shape == x2.shape, out2.shape
    assert jnp.allclose(out2, ref2, atol=1e-6, rtol=1e-6), "mismatch (fallback path)"

    print("KERNEL_OK")
</pallas_src>

<mosaic_0001>
module attributes {stable_mosaic.version = 11 : i64} {
  func.func @_scale_kernel(%arg0: i32, %arg1: i32, %arg2: memref<1x2048xf32, #tpu.memory_space<vmem>>, %arg3: memref<1x1xf32, #tpu.memory_space<smem>>, %arg4: memref<1x2048xf32, #tpu.memory_space<vmem>>) attributes {dimension_semantics = [#tpu.dimension_semantics<parallel>, #tpu.dimension_semantics<parallel>], iteration_bounds = array<i64: 1, 1>, scalar_prefetch = 0 : i64, scratch_operands = 0 : i64, tpu.core_type = #tpu.core_type<tc>, window_params = [{transform_indices = @transform_0, window_bounds = array<i64: 1, 2048>}, {transform_indices = @transform_1, window_bounds = array<i64: 1, 1>}, {transform_indices = @transform_2, window_bounds = array<i64: 1, 2048>}]} {
    %c0 = arith.constant 0 : index
    %c0_0 = arith.constant 0 : index
    %0 = memref.load %arg3[%c0, %c0_0] : memref<1x1xf32, #tpu.memory_space<smem>>
    %c0_1 = arith.constant 0 : index
    %c0_2 = arith.constant 0 : index
    %1 = vector.load %arg2[%c0_1, %c0_2] : memref<1x2048xf32, #tpu.memory_space<vmem>>, vector<1x2048xf32>
    %2 = vector.broadcast %0 : f32 to vector<1x2048xf32>
    %3 = arith.mulf %1, %2 : vector<1x2048xf32>
    %c0_3 = arith.constant 0 : index
    %c0_4 = arith.constant 0 : index
    %4 = vector.load %arg4[%c0_3, %c0_4] : memref<1x2048xf32, #tpu.memory_space<vmem>>, vector<1x2048xf32>
    tpu.vector_store %arg4[%c0_3, %c0_4], %3 {strides = array<i32>} : memref<1x2048xf32, #tpu.memory_space<vmem>>, vector<1x2048xf32>,
    return
  }
  func.func @transform_0(%arg0: i32, %arg1: i32) -> (i32, i32) {
    %c0_i32 = arith.constant 0 : i32
    return %arg0, %arg1 : i32, i32
  }
  func.func @transform_1(%arg0: i32, %arg1: i32) -> (i32, i32) {
    %c0_i32 = arith.constant 0 : i32
    %c0_i32_0 = arith.constant 0 : i32
    %c0_i32_1 = arith.constant 0 : i32
    return %c0_i32, %c0_i32_0 : i32, i32
  }
  func.func @transform_2(%arg0: i32, %arg1: i32) -> (i32, i32) {
    %c0_i32 = arith.constant 0 : i32
    return %arg0, %arg1 : i32, i32
  }
}

</mosaic_0001>

<bundles_post_ra>
// kernel: tpu_custom_call.1
= control target key start
LH: loop header
LB: loop body
LE: loop exit
PB: predicated region body
PF: predicated region fallthrough
CT: control target
= control target key end

     0   :  { %8 = vsyncpa [#allocation4], 0  ;;  %s142_s0 = inlined_call_operand.hbm [shape: f32[1,2048], index: 0, kind: input, shape index: {}]   ;;  %s143_s1 = inlined_call_operand.<no memory space> [shape: f32[1,1], index: 1, kind: input, shape index: {}]   ;;  %s144_s2 = inlined_call_operand.hbm [shape: f32[1,2048], index: 2, kind: output, shape index: {}]  }
   0x1   :  { %9 = vsyncpa [#allocation5], 0  ;;  %s98_s9 = smov [#allocation3]   ;;  %s50_s13 = scalar_lea.hbm %s142_s0, 256 }
   0x2   :  { %s16_s10 = sshll.u32 %s98_s9, 4  ;;  %p51_p0 = scmp.ne.s32.totalorder %s142_s0, %s50_s13  ;;  %s17_s10 = int_to_ptr.vmem [resolvable:$true] %s16_s10 }
   0x3   :  { %p54_p1 = scmp.lt.u32.totalorder %s50_s13, %s142_s0 }
   0x5   :  { %p56_p2 = pnand %p54_p1, %p51_p0 }
   0x7   :  { %59 = shalt.err (!%p56_p2)
}
   0x8   :  { %s60_s18 = scalar_lea.vmem %s17_s10, 256  ;;  %p65_p4 = scmp.lt.s32.totalorder %s17_s10, %s17_s10 }
   0x9   :  { %p61_p3 = scmp.ne.s32.totalorder %s17_s10, %s60_s18  ;;  %p66_p5 = scmp.lt.s32.totalorder %s60_s18, %s60_s18 }
   0xb   :  { %p67_p6 = por %p66_p5, %p65_p4 }
   0xd   :  { %p68_p7 = pnand %p67_p6, %p61_p3 }
   0xf   :  { %71 = shalt.err (!%p68_p7)
}
  0x10   :  { %19 = dma.hbm_to_vmem [thread:$0]  %s142_s0, 256, %s17_s10, [#allocation4]  }
  0x11   :  { %94 = dma.done.wait [#allocation4], 256  }
  0x12   :  { %95 = vsyncadd [#allocation4], 4294967040  ;;  %v28_v0 = vstv %s143_s1  ;;  %s99_s23 = smov [#allocation6]   ;;  %v26_v1 = vld [vmem:[#allocation3] sm:$0xff]  ;;  %v27_v2 = vld [vmem:[#allocation3 + $0x8] sm:$0xff] }
  0x13   :  { %s39_s24 = sshll.u32 %s99_s23, 4  ;;  %v29_v3 = vmul.f32 %v28_v0, %v26_v1  ;;  %v30_v4 = vmul.f32 %v28_v0, %v27_v2  ;;  %s40_s24 = int_to_ptr.vmem [resolvable:$true] %s39_s24 }
  0x14   :  { %s72_s25 = scalar_lea.vmem %s40_s24, 256  ;;  %p77_p9 = scmp.lt.s32.totalorder %s40_s24, %s40_s24 }
  0x15   :  { %31 = vst [vmem:[#allocation6] sm:$0xff] %v29_v3  ;;  %32 = vst [vmem:[#allocation6 + $0x8] sm:$0xff] %v30_v4  ;;  %p73_p8 = scmp.ne.s32.totalorder %s40_s24, %s72_s25  ;;  %p78_p10 = scmp.lt.s32.totalorder %s72_s25, %s72_s25 }
  0x17   :  { %p79_p11 = por %p78_p10, %p77_p9 }
  0x19   :  { %p80_p12 = pnand %p79_p11, %p73_p8 }
  0x1b   :  { %83 = shalt.err (!%p80_p12)
}
  0x1c   :  { %s84_s1 = scalar_lea.hbm %s144_s2, 256 }
  0x1d   :  { %p85_p13 = scmp.ne.s32.totalorder %s144_s2, %s84_s1  ;;  %p88_p0 = scmp.lt.u32.totalorder %s84_s1, %s144_s2 }
  0x1f   :  { %p90_p1 = pnand %p88_p0, %p85_p13 }
  0x21   :  { %93 = shalt.err (!%p90_p1)
}
  0x22   :  { %42 = dma.vmem_to_hbm [thread:$0]  %s40_s24, 256, %s144_s2, [#allocation5]  }
  0x23   :  { %96 = dma.done.wait [#allocation5], 256  }
  0x24   :  { %97 = vsyncadd [#allocation5], 4294967040 }
  0x25   :  { %46 = vsyncpa [#allocation4], 1 }
  0x26   :  { %47 = vsyncpa [#allocation5], 1 }

</bundles_post_ra>
